<compile_context>
chip_gen: v5e
topology: v5e:2x2
jax: 0.10.0
libtpu: 0.0.40
codegen_flags: <defaults>
</compile_context>

<pallas_src>
import functools

import jax
import jax.numpy as jnp
from jax.experimental import pallas as pl
from jax.experimental.pallas import tpu as pltpu

LANE = 128      # vreg lane width
SUBLANE = 8     # vreg sublane width


def _round_up(x, m):
    return ((x + m - 1) // m) * m


def _noconv_fused_kernel(*refs, num_layers):
    """refs = (xT_ref, wT0, b0, wT1, b1, ..., wT_{L-1}, b_{L-1}, oT_ref).

    Transposed MLP on one (K_pad, tm) batch tile: activations are carried as
    (features, tm) with the batch tile along the 128-lane axis, so the final
    1-wide output is emitted directly as a lane-dense (8, tm) block.
    Weights are bf16 (native MXU path), accumulation is f32, bias/ReLU f32.
    """
    x_ref = refs[0]
    o_ref = refs[-1]
    wb = refs[1:-1]

    h = x_ref[...]                                        # (K_pad, tm), bf16
    for li in range(num_layers):
        w_t = wb[2 * li][...]                             # (out_pad, in_pad), bf16
        b = wb[2 * li + 1][...]                           # (out_pad, 1), f32
        a = jnp.dot(w_t, h, preferred_element_type=jnp.float32) + b
        if li < num_layers - 1:
            h = jnp.maximum(a, 0.0).astype(w_t.dtype)     # bf16 for next MXU pass
        else:
            h = a                                         # final layer stays f32
    o_ref[...] = h.astype(o_ref.dtype)


def prepare_noconv_params(params, compute_dtype=jnp.bfloat16):
    """Pad / transpose / cast parameters ONCE (outside the per-call path).

    params: list of (W, b) with W stored as (in_features, out_features).
    Returns list of (W^T padded to (out_pad, in_pad) in `compute_dtype`,
                     b   padded to (out_pad, 1)      in float32).
    Hidden dims pad to 128 lanes; the final (1-wide) output pads to 8 sublanes.
    Zero padding keeps the padded rows/cols exactly zero through ReLU.
    """
    num_layers = len(params)
    prepared = []
    for li, (w, b) in enumerate(params):
        fin, fout = w.shape
        fin_pad = _round_up(fin, LANE)
        fout_pad = _round_up(fout, SUBLANE if li == num_layers - 1 else LANE)
        w_t = jnp.zeros((fout_pad, fin_pad), compute_dtype)
        w_t = w_t.at[:fout, :fin].set(w.T.astype(compute_dtype))
        b_p = jnp.zeros((fout_pad, 1), jnp.float32)
        b_p = b_p.at[:fout, 0].set(b.astype(jnp.float32))
        prepared.append((w_t, b_p))
    return prepared


@functools.partial(jax.jit, static_argnames=("n_out",))
def noconv_forward(prepared_params, x, *, n_out=1):
    """Apply the full NoConv stack with a single fused Pallas kernel.

    prepared_params: output of prepare_noconv_params (padded, transposed).
    x:               (M, input_features) float32.
    Returns (M, n_out) float32 (n_out = 1 for the NoConv module).
    """
    M, K = x.shape
    num_layers = len(prepared_params)
    compute_dtype = prepared_params[0][0].dtype
    K_pad = prepared_params[0][0].shape[1]
    out_pad = prepared_params[-1][0].shape[0]
    assert K <= K_pad

    # Batch tile along the 128-lane axis; go big (up to 512) when M allows
    # to amortize per-step overhead and keep the MXU / HBM pipeline fed.
    tm = min(512, _round_up(M, LANE))
    M_pad = _round_up(M, tm)

    # Pad + transpose + cast x; under jit this fuses into a single copy.
    x_t = jnp.zeros((K_pad, M_pad), compute_dtype)
    x_t = x_t.at[:K, :M].set(x.T.astype(compute_dtype))

    # --- specs ----------------------------------------------------------
    in_specs = [pl.BlockSpec((K_pad, tm), lambda i: (0, i))]   # streaming x
    flat_wb = []
    flops = 0
    w_bytes_resident = 0
    bytes_accessed = x_t.size * x_t.dtype.itemsize
    for (w_t, b_p) in prepared_params:
        # Constant block index -> single-buffered residents (saves VMEM, v7x).
        in_specs.append(pl.BlockSpec(w_t.shape, lambda i: (0, 0),
                                     pipeline_mode=pl.Buffered(1)))
        in_specs.append(pl.BlockSpec(b_p.shape, lambda i: (0, 0),
                                     pipeline_mode=pl.Buffered(1)))
        flat_wb += [w_t, b_p]
        nbytes = (w_t.size * w_t.dtype.itemsize
                  + b_p.size * b_p.dtype.itemsize)
        bytes_accessed += nbytes
        w_bytes_resident += nbytes
        flops += 2 * w_t.shape[0] * w_t.shape[1] * M_pad

    out_shape = jax.ShapeDtypeStruct((out_pad, M_pad), jnp.float32)
    out_spec = pl.BlockSpec((out_pad, tm), lambda i: (0, i))   # lane-dense
    bytes_accessed += out_pad * M_pad * 4

    itemsize = jnp.dtype(compute_dtype).itemsize
    vmem_needed = (2 * K_pad * tm * itemsize        # double-buffered x tiles
                   + 2 * out_pad * tm * 4           # double-buffered out tiles
                   + w_bytes_resident)              # single-buffered weights
    vmem_limit = int(min(96 << 20, max(16 << 20, 2 * vmem_needed + (4 << 20))))

    kernel = functools.partial(_noconv_fused_kernel, num_layers=num_layers)

    out_t = pl.pallas_call(
        kernel,
        out_shape=out_shape,
        grid=(M_pad // tm,),
        in_specs=in_specs,
        out_specs=out_spec,
        compiler_params=pltpu.CompilerParams(
            dimension_semantics=("parallel",),      # batch tiles independent
            vmem_limit_bytes=vmem_limit,
        ),
        cost_estimate=pl.CostEstimate(
            flops=flops, transcendentals=0, bytes_accessed=bytes_accessed),
    )(x_t, *flat_wb)

    # Rows [0:n_out] hold the real output; padded rows/cols are zero.
    return out_t[:n_out, :M].T.astype(jnp.float32)


def init_noconv_params(key, input_features, layers_sizes):
    """Deterministic params mirroring torch.nn.Linear default init
    (uniform(-1/sqrt(fan_in), 1/sqrt(fan_in)) for weight and bias).
    Weights stored as (in, out)."""
    inout = [(input_features, layers_sizes[0])]
    inout += list(zip(layers_sizes[:-1], layers_sizes[1:]))
    inout.append((layers_sizes[-1], 1))

    params = []
    for (fin, fout) in inout:
        key, kw, kb = jax.random.split(key, 3)
        bound = 1.0 / (fin ** 0.5)
        w = jax.random.uniform(kw, (fin, fout), jnp.float32, -bound, bound)
        b = jax.random.uniform(kb, (fout,), jnp.float32, -bound, bound)
        params.append((w, b))
    return params


if __name__ == "__main__":
    key = jax.random.PRNGKey(0)
    key, kx = jax.random.split(key)

    batch = 8
    input_features = 32
    layers_sizes = [32, 16]

    x = jax.random.normal(kx, (batch, input_features), jnp.float32)
    params = init_noconv_params(key, input_features, layers_sizes)

    prepared = prepare_noconv_params(params)      # pad/transpose/cast ONCE
    out = noconv_forward(prepared, x)
    out = jax.block_until_ready(out)

    # Reference check in plain JAX f32 (unpadded). bf16 matmul path in the
    # kernel => loosened tolerance vs. exact f32.
    ref = x
    for (w, b) in params[:-1]:
        ref = jnp.maximum(ref @ w + b, 0.0)
    ref = ref @ params[-1][0] + params[-1][1]

    assert out.shape == (batch, 1)
    assert jnp.allclose(out, ref, atol=3e-2, rtol=3e-2), (
        "max abs err = %f" % float(jnp.max(jnp.abs(out - ref))))

    print("KERNEL_OK")
</pallas_src>

<mosaic_0001>
module attributes {stable_mosaic.version = 11 : i64} {
  func.func @_noconv_fused_kernel(%arg0: i32, %arg1: memref<128x128xbf16, #tpu.memory_space<vmem>>, %arg2: memref<128x128xbf16, #tpu.memory_space<vmem>>, %arg3: memref<128x1xf32, #tpu.memory_space<vmem>>, %arg4: memref<128x128xbf16, #tpu.memory_space<vmem>>, %arg5: memref<128x1xf32, #tpu.memory_space<vmem>>, %arg6: memref<8x128xbf16, #tpu.memory_space<vmem>>, %arg7: memref<8x1xf32, #tpu.memory_space<vmem>>, %arg8: memref<8x128xf32, #tpu.memory_space<vmem>>) attributes {dimension_semantics = [#tpu.dimension_semantics<parallel>], iteration_bounds = array<i64: 1>, scalar_prefetch = 0 : i64, scratch_operands = 0 : i64, tpu.core_type = #tpu.core_type<tc>, window_params = [{transform_indices = @transform_0, window_bounds = array<i64: 128, 128>}, {pipeline_mode = #tpu.pipeline_mode<synchronous>, transform_indices = @transform_1, window_bounds = array<i64: 128, 128>}, {pipeline_mode = #tpu.pipeline_mode<synchronous>, transform_indices = @transform_2, window_bounds = array<i64: 128, 1>}, {pipeline_mode = #tpu.pipeline_mode<synchronous>, transform_indices = @transform_3, window_bounds = array<i64: 128, 128>}, {pipeline_mode = #tpu.pipeline_mode<synchronous>, transform_indices = @transform_4, window_bounds = array<i64: 128, 1>}, {pipeline_mode = #tpu.pipeline_mode<synchronous>, transform_indices = @transform_5, window_bounds = array<i64: 8, 128>}, {pipeline_mode = #tpu.pipeline_mode<synchronous>, transform_indices = @transform_6, window_bounds = array<i64: 8, 1>}, {transform_indices = @transform_7, window_bounds = array<i64: 8, 128>}]} {
    %c0 = arith.constant 0 : index
    %c0_0 = arith.constant 0 : index
    %0 = vector.load %arg1[%c0, %c0_0] : memref<128x128xbf16, #tpu.memory_space<vmem>>, vector<128x128xbf16>
    %c0_1 = arith.constant 0 : index
    %c0_2 = arith.constant 0 : index
    %1 = vector.load %arg2[%c0_1, %c0_2] : memref<128x128xbf16, #tpu.memory_space<vmem>>, vector<128x128xbf16>
    %c0_3 = arith.constant 0 : index
    %c0_4 = arith.constant 0 : index
    %2 = vector.load %arg3[%c0_3, %c0_4] : memref<128x1xf32, #tpu.memory_space<vmem>>, vector<128x1xf32>
    %cst = arith.constant dense<0.000000e+00> : vector<128x128xf32>
    %3 = tpu.matmul %1, %0, %cst {dimension_numbers = #tpu.dot_dimension_numbers<[1], [0], [0], [1], [0, 0, 1, 1], [], []>} : vector<128x128xbf16>, vector<128x128xbf16>, vector<128x128xf32> -> vector<128x128xf32>
    %4 = vector.broadcast %2 : vector<128x1xf32> to vector<128x128xf32>
    %5 = arith.addf %3, %4 : vector<128x128xf32>
    %cst_5 = arith.constant 0.000000e+00 : f32
    %6 = vector.broadcast %cst_5 : f32 to vector<128x128xf32>
    %7 = arith.maximumf %5, %6 : vector<128x128xf32>
    %8 = arith.truncf %7 : vector<128x128xf32> to vector<128x128xbf16>
    %c0_6 = arith.constant 0 : index
    %c0_7 = arith.constant 0 : index
    %9 = vector.load %arg4[%c0_6, %c0_7] : memref<128x128xbf16, #tpu.memory_space<vmem>>, vector<128x128xbf16>
    %c0_8 = arith.constant 0 : index
    %c0_9 = arith.constant 0 : index
    %10 = vector.load %arg5[%c0_8, %c0_9] : memref<128x1xf32, #tpu.memory_space<vmem>>, vector<128x1xf32>
    %cst_10 = arith.constant dense<0.000000e+00> : vector<128x128xf32>
    %11 = tpu.matmul %9, %8, %cst_10 {dimension_numbers = #tpu.dot_dimension_numbers<[1], [0], [0], [1], [0, 0, 1, 1], [], []>} : vector<128x128xbf16>, vector<128x128xbf16>, vector<128x128xf32> -> vector<128x128xf32>
    %12 = vector.broadcast %10 : vector<128x1xf32> to vector<128x128xf32>
    %13 = arith.addf %11, %12 : vector<128x128xf32>
    %cst_11 = arith.constant 0.000000e+00 : f32
    %14 = vector.broadcast %cst_11 : f32 to vector<128x128xf32>
    %15 = arith.maximumf %13, %14 : vector<128x128xf32>
    %16 = arith.truncf %15 : vector<128x128xf32> to vector<128x128xbf16>
    %c0_12 = arith.constant 0 : index
    %c0_13 = arith.constant 0 : index
    %17 = vector.load %arg6[%c0_12, %c0_13] : memref<8x128xbf16, #tpu.memory_space<vmem>>, vector<8x128xbf16>
    %c0_14 = arith.constant 0 : index
    %c0_15 = arith.constant 0 : index
    %18 = vector.load %arg7[%c0_14, %c0_15] : memref<8x1xf32, #tpu.memory_space<vmem>>, vector<8x1xf32>
    %cst_16 = arith.constant dense<0.000000e+00> : vector<8x128xf32>
    %19 = tpu.matmul %17, %16, %cst_16 {dimension_numbers = #tpu.dot_dimension_numbers<[1], [0], [0], [1], [0, 0, 1, 1], [], []>} : vector<8x128xbf16>, vector<128x128xbf16>, vector<8x128xf32> -> vector<8x128xf32>
    %20 = vector.broadcast %18 : vector<8x1xf32> to vector<8x128xf32>
    %21 = arith.addf %19, %20 : vector<8x128xf32>
    %c0_17 = arith.constant 0 : index
    %c0_18 = arith.constant 0 : index
    %22 = vector.load %arg8[%c0_17, %c0_18] : memref<8x128xf32, #tpu.memory_space<vmem>>, vector<8x128xf32>
    tpu.vector_store %arg8[%c0_17, %c0_18], %21 {strides = array<i32>} : memref<8x128xf32, #tpu.memory_space<vmem>>, vector<8x128xf32>,
    return
  }
  func.func @transform_0(%arg0: i32) -> (i32, i32) {
    %c0_i32 = arith.constant 0 : i32
    %c0_i32_0 = arith.constant 0 : i32
    return %c0_i32, %arg0 : i32, i32
  }
  func.func @transform_1(%arg0: i32) -> (i32, i32) {
    %c0_i32 = arith.constant 0 : i32
    %c0_i32_0 = arith.constant 0 : i32
    %c0_i32_1 = arith.constant 0 : i32
    return %c0_i32, %c0_i32_0 : i32, i32
  }
  func.func @transform_2(%arg0: i32) -> (i32, i32) {
    %c0_i32 = arith.constant 0 : i32
    %c0_i32_0 = arith.constant 0 : i32
    %c0_i32_1 = arith.constant 0 : i32
    return %c0_i32, %c0_i32_0 : i32, i32
  }
  func.func @transform_3(%arg0: i32) -> (i32, i32) {
    %c0_i32 = arith.constant 0 : i32
    %c0_i32_0 = arith.constant 0 : i32
    %c0_i32_1 = arith.constant 0 : i32
    return %c0_i32, %c0_i32_0 : i32, i32
  }
  func.func @transform_4(%arg0: i32) -> (i32, i32) {
    %c0_i32 = arith.constant 0 : i32
    %c0_i32_0 = arith.constant 0 : i32
    %c0_i32_1 = arith.constant 0 : i32
    return %c0_i32, %c0_i32_0 : i32, i32
  }
  func.func @transform_5(%arg0: i32) -> (i32, i32) {
    %c0_i32 = arith.constant 0 : i32
    %c0_i32_0 = arith.constant 0 : i32
    %c0_i32_1 = arith.constant 0 : i32
    return %c0_i32, %c0_i32_0 : i32, i32
  }
  func.func @transform_6(%arg0: i32) -> (i32, i32) {
    %c0_i32 = arith.constant 0 : i32
    %c0_i32_0 = arith.constant 0 : i32
    %c0_i32_1 = arith.constant 0 : i32
    return %c0_i32, %c0_i32_0 : i32, i32
  }
  func.func @transform_7(%arg0: i32) -> (i32, i32) {
    %c0_i32 = arith.constant 0 : i32
    %c0_i32_0 = arith.constant 0 : i32
    return %c0_i32, %arg0 : i32, i32
  }
}

</mosaic_0001>

<bundles_post_ra>
// kernel: noconv_forward.1
= control target key start
LH: loop header
LB: loop body
LE: loop exit
PB: predicated region body
PF: predicated region fallthrough
CT: control target
= control target key end

     0   :  { %v721_v1 = vmov 0   ;;  %s946_s0 = inlined_call_operand.vmem [shape: bf16[128,128], index: 0, kind: input, shape index: {}]   ;;  %s947_s2 = inlined_call_operand.vmem [shape: f32[128,1], index: 2, kind: input, shape index: {}]   ;;  %s948_s1 = inlined_call_operand.vmem [shape: bf16[128,128], index: 1, kind: input, shape index: {}]   ;;  %s949_s4 = inlined_call_operand.vmem [shape: f32[128,1], index: 4, kind: input, shape index: {}]   ;;  %s950_s6 = inlined_call_operand.vmem [shape: f32[8,1], index: 6, kind: input, shape index: {}]   ;;  %s951_s3 = inlined_call_operand.vmem [shape: bf16[128,128], index: 3, kind: input, shape index: {}]   ;;  %s952_s5 = inlined_call_operand.vmem [shape: bf16[8,128], index: 5, kind: input, shape index: {}]   ;;  %s953_s7 = inlined_call_operand.vmem [shape: f32[8,128], index: 7, kind: output, shape index: {}]  }
   0x1   :  { %v684_v0 = vld [vmem:[%s946_s0 + $0x38] sm:$0xff]  ;;  %718 = vset.pattern.permute.xlu0 %v721_v1  ;;  %719 = vset.pattern.permute.xlu1 %v721_v1  ;;  %v72_v2 = vld [vmem:[%s947_s2 + $0x70] sm:$0xff]  ;;  %v70_v3 = vld [vmem:[%s947_s2 + $0x60] sm:$0xff] }
   0x2   :  { %720 = vset.pattern.permute.xlu2 %v721_v1  ;;  %250 = vmatpush.bf16.msra.mxu0 %v684_v0  ;;  %v683_v4 = vld [vmem:[%s946_s0 + $0x30] sm:$0xff]  ;;  %v682_v6 = vld [vmem:[%s946_s0 + $0x28] sm:$0xff]  ;;  %v73_v7 = vld [vmem:[%s947_s2 + $0x78] sm:$0xff] }
   0x3   :  { %701 = vmatpush.bf16.msra.mxu3 %v684_v0  ;;  %146 = vperm.xlu0 %718, %v72_v2   ;;  %v68_v5 = vld [vmem:[%s947_s2 + $0x50] sm:$0xff]  ;;  %v71_v8 = vld [vmem:[%s947_s2 + $0x68] sm:$0xff]  ;;  %v681_v9 = vld [vmem:[%s946_s0 + $0x20] sm:$0xff] }
   0x4   :  { %136 = vperm.xlu1 %719, %v70_v3   ;;  %126 = vperm.xlu2 %720, %v68_v5   ;;  %v69_v10 = vld [vmem:[%s947_s2 + $0x58] sm:$0xff]  ;;  %v66_v12 = vld [vmem:[%s947_s2 + $0x40] sm:$0xff]  ;;  %v67_v13 = vld [vmem:[%s947_s2 + $0x48] sm:$0xff] }
   0x5   :  { %v680_v11 = vld [vmem:[%s946_s0 + $0x18] sm:$0xff]  ;;  %v679_v14 = vld [vmem:[%s946_s0 + $0x10] sm:$0xff]  ;;  %v678_v16 = vld [vmem:[%s946_s0 + $0x8] sm:$0xff] }
   0x6   :  { %251 = vmatpush.bf16.msra.mxu0 %v683_v4  ;;  %v64_v15 = vld [vmem:[%s947_s2 + $0x30] sm:$0xff]  ;;  %v65_v17 = vld [vmem:[%s947_s2 + $0x38] sm:$0xff]  ;;  %v62_v18 = vld [vmem:[%s947_s2 + $0x20] sm:$0xff] }
   0x7   :  { %702 = vmatpush.bf16.msra.mxu3 %v683_v4  ;;  %v677_v19 = vld [vmem:[%s946_s0] sm:$0xff]  ;;  %v63_v20 = vld [vmem:[%s947_s2 + $0x28] sm:$0xff]  ;;  %v60_v23 = vld [vmem:[%s947_s2 + $0x10] sm:$0xff] }
   0x8   :  { %v685_v21 = vld [vmem:[%s948_s1] sm:$0xff]  ;;  %v690_v22 = vld [vmem:[%s948_s1 + $0x28] sm:$0xff]  ;;  %v61_v24 = vld [vmem:[%s947_s2 + $0x18] sm:$0xff] }
   0x9   :  { %v58_v25 = vld [vmem:[%s947_s2] sm:$0xff]  ;;  %v59_v26 = vld [vmem:[%s947_s2 + $0x8] sm:$0xff]  ;;  %v353_v27 = vld [vmem:[%s949_s4 + $0x70] sm:$0xff] }
   0xa   :  { %252 = vmatpush.bf16.msra.mxu0 %v682_v6  ;;  %v686_v28 = vld [vmem:[%s948_s1 + $0x8] sm:$0xff]  ;;  %v691_v29 = vld [vmem:[%s948_s1 + $0x30] sm:$0xff]  ;;  %v351_v30 = vld [vmem:[%s949_s4 + $0x60] sm:$0xff] }
   0xb   :  { %703 = vmatpush.bf16.msra.mxu3 %v682_v6  ;;  %151 = vperm.xlu0 %718, %v73_v7   ;;  %v352_v31 = vld [vmem:[%s949_s4 + $0x68] sm:$0xff]  ;;  %v354_v32 = vld [vmem:[%s949_s4 + $0x78] sm:$0xff]  ;;  %v349_v33 = vld [vmem:[%s949_s4 + $0x50] sm:$0xff] }
   0xc   :  { %141 = vperm.xlu1 %719, %v71_v8   ;;  %131 = vperm.xlu2 %720, %v69_v10   ;;  %v350_v34 = vld [vmem:[%s949_s4 + $0x58] sm:$0xff]  ;;  %v347_v35 = vld [vmem:[%s949_s4 + $0x40] sm:$0xff]  ;;  %v687_v36 = vld [vmem:[%s948_s1 + $0x10] sm:$0xff] }
   0xd   :  { %v692_v37 = vld [vmem:[%s948_s1 + $0x38] sm:$0xff]  ;;  %v345_v38 = vld [vmem:[%s949_s4 + $0x30] sm:$0xff]  ;;  %v348_v40 = vld [vmem:[%s949_s4 + $0x48] sm:$0xff] }
   0xe   :  { %253 = vmatpush.bf16.msra.mxu0 %v681_v9  ;;  %v346_v39 = vld [vmem:[%s949_s4 + $0x38] sm:$0xff]  ;;  %v343_v41 = vld [vmem:[%s949_s4 + $0x20] sm:$0xff]  ;;  %v344_v42 = vld [vmem:[%s949_s4 + $0x28] sm:$0xff] }
   0xf   :  { %704 = vmatpush.bf16.msra.mxu3 %v681_v9  ;;  %v341_v43 = vld [vmem:[%s949_s4 + $0x10] sm:$0xff]  ;;  %v688_v44 = vld [vmem:[%s948_s1 + $0x18] sm:$0xff]  ;;  %v339_v46 = vld [vmem:[%s949_s4] sm:$0xff] }
  0x10   :  { %v342_v45 = vld [vmem:[%s949_s4 + $0x18] sm:$0xff]  ;;  %v340_v47 = vld [vmem:[%s949_s4 + $0x8] sm:$0xff]  ;;  %v557_v48 = vld [vmem:[%s950_s6] sm:$0xff] }
  0x11   :  { %v689_v49 = vld [vmem:[%s948_s1 + $0x20] sm:$0xff] }
  0x12   :  { %254 = vmatpush.bf16.msra.mxu0 %v680_v11 }
  0x13   :  { %705 = vmatpush.bf16.msra.mxu3 %v680_v11  ;;  %116 = vperm.xlu0 %718, %v66_v12  }
  0x14   :  { %121 = vperm.xlu1 %719, %v67_v13   ;;  %106 = vperm.xlu2 %720, %v64_v15  }
  0x16   :  { %255 = vmatpush.bf16.msra.mxu0 %v679_v14 }
  0x17   :  { %706 = vmatpush.bf16.msra.mxu3 %v679_v14 }
  0x1a   :  { %256 = vmatpush.bf16.msra.mxu0 %v678_v16 }
  0x1b   :  { %707 = vmatpush.bf16.msra.mxu3 %v678_v16  ;;  %111 = vperm.xlu0 %718, %v65_v17  }
  0x1c   :  { %96 = vperm.xlu1 %719, %v62_v18   ;;  %101 = vperm.xlu2 %720, %v63_v20  }
  0x1e   :  { %257 = vmatpush.bf16.msra.mxu0 %v677_v19 }
  0x1f   :  { %708 = vmatpush.bf16.msra.mxu3 %v677_v19 }
  0x21   :  { %258 = vmatmul.bf16.vlgmr.msra.gmra.mxu0 %v685_v21 }
  0x22   :  { %283 = vmatmul.bf16.vlgmr.msra.gmra.mxu3 %v690_v22 }
  0x23   :  { %86 = vperm.xlu0 %718, %v60_v23  }
  0x24   :  { %91 = vperm.xlu1 %719, %v61_v24   ;;  %76 = vperm.xlu2 %720, %v58_v25  }
  0x2b   :  { %81 = vperm.xlu0 %718, %v59_v26  }
  0x2c   :  { %427 = vperm.xlu1 %719, %v353_v27   ;;  %432 = vperm.xlu2 %720, %v354_v32  }
  0x31   :  { %263 = vmatmul.bf16.gmra.mxu0 %v686_v28 }
  0x32   :  { %288 = vmatmul.bf16.gmra.mxu3 %v691_v29 }
  0x33   :  { %417 = vperm.xlu0 %718, %v351_v30  }
  0x34   :  { %422 = vperm.xlu1 %719, %v352_v31   ;;  %407 = vperm.xlu2 %720, %v349_v33  }
  0x3b   :  { %412 = vperm.xlu0 %718, %v350_v34  }
  0x3c   :  { %397 = vperm.xlu1 %719, %v347_v35   ;;  %402 = vperm.xlu2 %720, %v348_v40  }
  0x41   :  { %268 = vmatmul.bf16.gmra.mxu0 %v687_v36 }
  0x42   :  { %293 = vmatmul.bf16.gmra.mxu3 %v692_v37 }
  0x43   :  { %387 = vperm.xlu0 %718, %v345_v38  }
  0x44   :  { %392 = vperm.xlu1 %719, %v346_v39   ;;  %377 = vperm.xlu2 %720, %v343_v41  }
  0x4b   :  { %382 = vperm.xlu0 %718, %v344_v42  }
  0x4c   :  { %367 = vperm.xlu1 %719, %v341_v43   ;;  %372 = vperm.xlu2 %720, %v342_v45  }
  0x51   :  { %273 = vmatmul.bf16.gmra.mxu0 %v688_v44 }
  0x53   :  { %357 = vperm.xlu0 %718, %v339_v46  }
  0x54   :  { %362 = vperm.xlu1 %719, %v340_v47   ;;  %560 = vperm.xlu2 %720, %v557_v48  }
  0x5e   :  { %v127_v51 = vpop.permute.xlu2 %126 }
  0x61   :  { %278 = vmatmul.bf16.gmra.mxu0 %v689_v49 }
  0x66   :  { %v132_v53 = vpop.permute.xlu2 %131 }
  0x6e   :  { %v107_v55 = vpop.permute.xlu2 %106 }
  0x75   :  { %v147_v50 = vpop.permute.xlu0 %146 }
  0x76   :  { %v102_v57 = vpop.permute.xlu2 %101  ;;  %v137_v11 = vpop.permute.xlu1 %136 }
  0x7d   :  { %v152_v52 = vpop.permute.xlu0 %151 }
  0x7e   :  { %v77_v60 = vpop.permute.xlu2 %76  ;;  %v142_v15 = vpop.permute.xlu1 %141 }
  0x85   :  { %v117_v54 = vpop.permute.xlu0 %116 }
  0x86   :  { %v122_v33 = vpop.permute.xlu1 %121 }
  0x8d   :  { %v112_v56 = vpop.permute.xlu0 %111 }
  0x8e   :  { %v97_v35 = vpop.permute.xlu1 %96 }
  0x95   :  { %v909_v58 = vpop.permute.xlu0 %86 }
  0x96   :  { %v92_v48 = vpop.permute.xlu1 %91 }
  0x9d   :  { %v82_v62 = vpop.permute.xlu0 %81 }
  0x9e   :  { %v259_v59 = vpop.f32.mrf.mxu0 }
  0x9f   :  { %v260_v63 = vadd.f32 %v259_v59, %v77_v60  ;;  %v693_v59 = vld [vmem:[%s951_s3] sm:$0xff]  ;;  %v698_v60 = vld [vmem:[%s951_s3 + $0x28] sm:$0xff] }
  0xa1   :  { %v299_v2 = vmax.f32 %v260_v63, 0.0  ;;  %v700_v63 = vld [vmem:[%s951_s3 + $0x38] sm:$0xff] }
  0xa5   :  { %v284_v61 = vpop.f32.mrf.mxu3 }
  0xa6   :  { %v261_v0 = vpop.f32.mrf.mxu0  ;;  %v285_v23 = vadd.f32 %v284_v61, %v127_v51  ;;  %v699_v61 = vld [vmem:[%s951_s3 + $0x30] sm:$0xff] }
  0xa7   :  { %v262_v1 = vadd.f32 %v261_v0, %v82_v62  ;;  %v695_v62 = vld [vmem:[%s951_s3 + $0x10] sm:$0xff]  ;;  %v696_v0 = vld [vmem:[%s951_s3 + $0x18] sm:$0xff] }
  0xa8   :  { %v309_v28 = vmax.f32 %v285_v23, 0.0 }
  0xa9   :  { %v300_v3 = vmax.f32 %v262_v1, 0.0  ;;  %v697_v1 = vld [vmem:[%s951_s3 + $0x20] sm:$0xff] }
  0xab   :  { %v911_v4 = vpack.c.bf16 %v300_v3, %v299_v2  ;;  %v428_v2 = vpop.permute.xlu1 %427  ;;  %v418_v3 = vpop.permute.xlu0 %417 }
  0xad   :  { %v286_v5 = vpop.f32.mrf.mxu3 }
  0xae   :  { %v264_v6 = vpop.f32.mrf.mxu0  ;;  %v287_v24 = vadd.f32 %v286_v5, %v132_v53 }
  0xb0   :  { %v310_v29 = vmax.f32 %v287_v24, 0.0 }
  0xb2   :  { %v320_v32 = vpack.c.bf16 %v310_v29, %v309_v28  ;;  %v433_v28 = vpop.permute.xlu2 %432 }
  0xb3   :  { %v413_v5 = vpop.permute.xlu0 %412 }
  0xb5   :  { %v289_v7 = vpop.f32.mrf.mxu3 }
  0xb6   :  { %v266_v8 = vpop.f32.mrf.mxu0  ;;  %v290_v17 = vadd.f32 %v289_v7, %v137_v11 }
  0xb7   :  { %v267_v49 = vadd.f32 %v266_v8, %v92_v48 }
  0xb8   :  { %v311_v25 = vmax.f32 %v290_v17, 0.0 }
  0xbb   :  { %v388_v7 = vpop.permute.xlu0 %387 }
  0xbd   :  { %v291_v9 = vpop.f32.mrf.mxu3 }
  0xbe   :  { %v269_v10 = vpop.f32.mrf.mxu0  ;;  %v292_v18 = vadd.f32 %v291_v9, %v142_v15 }
  0xbf   :  { %v270_v46 = vadd.f32 %v269_v10, %v97_v35 }
  0xc0   :  { %v312_v26 = vmax.f32 %v292_v18, 0.0 }
  0xc1   :  { %v303_v53 = vmax.f32 %v270_v46, 0.0 }
  0xc2   :  { %v321_v30 = vpack.c.bf16 %v312_v26, %v311_v25 }
  0xc3   :  { %v383_v9 = vpop.permute.xlu0 %382 }
  0xc5   :  { %v294_v12 = vpop.f32.mrf.mxu3 }
  0xc6   :  { %v271_v13 = vpop.f32.mrf.mxu0  ;;  %v295_v14 = vadd.f32 %v294_v12, %v147_v50 }
  0xc7   :  { %v272_v43 = vadd.f32 %v271_v13, %v102_v57 }
  0xc8   :  { %v313_v19 = vmax.f32 %v295_v14, 0.0 }
  0xc9   :  { %v304_v50 = vmax.f32 %v272_v43, 0.0 }
  0xcb   :  { %v358_v12 = vpop.permute.xlu0 %357 }
  0xcd   :  { %v296_v16 = vpop.f32.mrf.mxu3 }
  0xce   :  { %v297_v20 = vadd.f32 %v296_v16, %v152_v52  ;;  %v274_v21 = vpop.f32.mrf.mxu0  ;;  %v265_v52 = vadd.f32 %v264_v6, %v909_v58  ;;  %v694_v58 = vld [vmem:[%s951_s3 + $0x8] sm:$0xff] }
  0xcf   :  { %v275_v40 = vadd.f32 %v274_v21, %v107_v55  ;;  %v317_v55 = vpack.c.bf16 %v304_v50, %v303_v53 }
  0xd0   :  { %v314_v22 = vmax.f32 %v297_v20, 0.0 }
  0xd1   :  { %v305_v47 = vmax.f32 %v275_v40, 0.0 }
  0xd2   :  { %v322_v27 = vpack.c.bf16 %v314_v22, %v313_v19 }
  0xd4   :  { %483 = vmatpush.bf16.msra.mxu1 %v322_v27  ;;  %709 = vmatpush.bf16.msra.mxu2 %v322_v27 }
  0xd6   :  { %v276_v31 = vpop.f32.mrf.mxu0 }
  0xd7   :  { %v277_v38 = vadd.f32 %v276_v31, %v112_v56  ;;  %v301_v56 = vmax.f32 %v265_v52, 0.0 }
  0xd8   :  { %484 = vmatpush.bf16.msra.mxu1 %v321_v30  ;;  %710 = vmatpush.bf16.msra.mxu2 %v321_v30 }
  0xd9   :  { %v306_v44 = vmax.f32 %v277_v38, 0.0  ;;  %v408_v38 = vpop.permute.xlu2 %407 }
  0xdb   :  { %v318_v51 = vpack.c.bf16 %v306_v44, %v305_v47 }
  0xdc   :  { %485 = vmatpush.bf16.msra.mxu1 %v320_v32  ;;  %711 = vmatpush.bf16.msra.mxu2 %v320_v32 }
  0xde   :  { %v279_v34 = vpop.f32.mrf.mxu0 }
  0xdf   :  { %v280_v36 = vadd.f32 %v279_v34, %v117_v54  ;;  %v302_v54 = vmax.f32 %v267_v49, 0.0 }
  0xe1   :  { %v307_v41 = vmax.f32 %v280_v36, 0.0  ;;  %v316_v57 = vpack.c.bf16 %v302_v54, %v301_v56  ;;  %v403_v49 = vpop.permute.xlu2 %402 }
  0xe6   :  { %v281_v37 = vpop.f32.mrf.mxu0 }
  0xe7   :  { %v282_v39 = vadd.f32 %v281_v37, %v122_v33 }
  0xe9   :  { %v308_v42 = vmax.f32 %v282_v39, 0.0 }
  0xeb   :  { %v319_v45 = vpack.c.bf16 %v308_v42, %v307_v41 }
  0xed   :  { %486 = vmatpush.bf16.msra.mxu1 %v319_v45  ;;  %712 = vmatpush.bf16.msra.mxu2 %v319_v45 }
  0xf1   :  { %487 = vmatpush.bf16.msra.mxu1 %v318_v51  ;;  %713 = vmatpush.bf16.msra.mxu2 %v318_v51  ;;  %v378_v51 = vpop.permute.xlu2 %377 }
  0xf5   :  { %488 = vmatpush.bf16.msra.mxu1 %v317_v55  ;;  %714 = vmatpush.bf16.msra.mxu2 %v317_v55 }
  0xf9   :  { %489 = vmatpush.bf16.msra.mxu1 %v316_v57  ;;  %715 = vmatpush.bf16.msra.mxu2 %v316_v57 }
  0xfd   :  { %490 = vmatpush.bf16.msra.mxu1 %v911_v4  ;;  %716 = vmatpush.bf16.msra.mxu2 %v911_v4  ;;  %v423_v4 = vpop.permute.xlu1 %422 }
 0x100   :  { %491 = vmatmul.bf16.vlgmr.msra.gmra.mxu1 %v693_v59  ;;  %516 = vmatmul.bf16.vlgmr.msra.gmra.mxu2 %v698_v60 }
 0x105   :  { %v398_v6 = vpop.permute.xlu1 %397 }
 0x10d   :  { %v393_v8 = vpop.permute.xlu1 %392 }
 0x110   :  { %496 = vmatmul.bf16.gmra.mxu1 %v694_v58  ;;  %521 = vmatmul.bf16.gmra.mxu2 %v699_v61 }
 0x115   :  { %v368_v10 = vpop.permute.xlu1 %367 }
 0x11d   :  { %v363_v15 = vpop.permute.xlu1 %362 }
 0x120   :  { %501 = vmatmul.bf16.gmra.mxu1 %v695_v62  ;;  %526 = vmatmul.bf16.gmra.mxu2 %v700_v63 }
 0x130   :  { %506 = vmatmul.bf16.gmra.mxu1 %v696_v0  ;;  %v373_v0 = vpop.permute.xlu2 %372 }
 0x140   :  { %511 = vmatmul.bf16.gmra.mxu1 %v697_v1 }
 0x17d   :  { %v492_v11 = vpop.f32.mrf.mxu1 }
 0x17e   :  { %v493_v14 = vadd.f32 %v492_v11, %v358_v12  ;;  %v561_v12 = vpop.permute.xlu2 %560 }
 0x180   :  { %v532_v18 = vmax.f32 %v493_v14, 0.0 }
 0x183   :  { %v517_v13 = vpop.f32.mrf.mxu2 }
 0x184   :  { %v518_v42 = vadd.f32 %v517_v13, %v408_v38 }
 0x185   :  { %v494_v16 = vpop.f32.mrf.mxu1 }
 0x186   :  { %v495_v17 = vadd.f32 %v494_v16, %v363_v15  ;;  %v542_v47 = vmax.f32 %v518_v42, 0.0 }
 0x188   :  { %v533_v19 = vmax.f32 %v495_v17, 0.0 }
 0x18a   :  { %v548_v20 = vpack.c.bf16 %v533_v19, %v532_v18 }
 0x18b   :  { %v519_v21 = vpop.f32.mrf.mxu2 }
 0x18c   :  { %v520_v39 = vadd.f32 %v519_v21, %v413_v5 }
 0x18d   :  { %v497_v22 = vpop.f32.mrf.mxu1 }
 0x18e   :  { %v543_v44 = vmax.f32 %v520_v39, 0.0 }
 0x190   :  { %v553_v48 = vpack.c.bf16 %v543_v44, %v542_v47 }
 0x193   :  { %v522_v23 = vpop.f32.mrf.mxu2 }
 0x194   :  { %v523_v35 = vadd.f32 %v522_v23, %v418_v3 }
 0x195   :  { %v499_v24 = vpop.f32.mrf.mxu1 }
 0x196   :  { %v544_v43 = vmax.f32 %v523_v35, 0.0  ;;  %v500_v1 = vadd.f32 %v499_v24, %v373_v0 }
 0x19b   :  { %v524_v25 = vpop.f32.mrf.mxu2 }
 0x19c   :  { %v525_v32 = vadd.f32 %v524_v25, %v423_v4  ;;  %v498_v4 = vadd.f32 %v497_v22, %v368_v10 }
 0x19d   :  { %v502_v26 = vpop.f32.mrf.mxu1 }
 0x19e   :  { %v545_v40 = vmax.f32 %v525_v32, 0.0  ;;  %v503_v62 = vadd.f32 %v502_v26, %v378_v51 }
 0x1a0   :  { %v554_v45 = vpack.c.bf16 %v545_v40, %v544_v43  ;;  %v536_v5 = vmax.f32 %v503_v62, 0.0 }
 0x1a3   :  { %v527_v27 = vpop.f32.mrf.mxu2 }
 0x1a4   :  { %v528_v30 = vadd.f32 %v527_v27, %v428_v2 }
 0x1a5   :  { %v504_v29 = vpop.f32.mrf.mxu1 }
 0x1a6   :  { %v546_v36 = vmax.f32 %v528_v30, 0.0  ;;  %v505_v60 = vadd.f32 %v504_v29, %v383_v9  ;;  %v556_v9 = vld [vmem:[%s952_s5] sm:$0xf] }
 0x1a8   :  { %v537_v2 = vmax.f32 %v505_v60, 0.0 }
 0x1aa   :  { %v550_v11 = vpack.c.bf16 %v537_v2, %v536_v5 }
 0x1ab   :  { %v529_v31 = vpop.f32.mrf.mxu2 }
 0x1ac   :  { %v530_v33 = vadd.f32 %v529_v31, %v433_v28 }
 0x1ad   :  { %v507_v34 = vpop.f32.mrf.mxu1 }
 0x1ae   :  { %v547_v37 = vmax.f32 %v530_v33, 0.0  ;;  %v508_v56 = vadd.f32 %v507_v34, %v388_v7 }
 0x1b0   :  { %v555_v41 = vpack.c.bf16 %v547_v37, %v546_v36  ;;  %v538_v63 = vmax.f32 %v508_v56, 0.0 }
 0x1b2   :  { %563 = vmatpush.bf16.msrb.mxu2 %v555_v41 }
 0x1b5   :  { %v509_v46 = vpop.f32.mrf.mxu1 }
 0x1b6   :  { %564 = vmatpush.bf16.msrb.mxu2 %v554_v45  ;;  %v510_v54 = vadd.f32 %v509_v46, %v393_v8  ;;  %v534_v8 = vmax.f32 %v498_v4, 0.0 }
 0x1b8   :  { %v539_v58 = vmax.f32 %v510_v54, 0.0 }
 0x1ba   :  { %565 = vmatpush.bf16.msrb.mxu2 %v553_v48  ;;  %v551_v3 = vpack.c.bf16 %v539_v58, %v538_v63 }
 0x1bd   :  { %v512_v50 = vpop.f32.mrf.mxu1 }
 0x1be   :  { %v513_v52 = vadd.f32 %v512_v50, %v398_v6  ;;  %v535_v6 = vmax.f32 %v500_v1, 0.0 }
 0x1c0   :  { %v540_v57 = vmax.f32 %v513_v52, 0.0  ;;  %v549_v7 = vpack.c.bf16 %v535_v6, %v534_v8 }
 0x1c5   :  { %v514_v53 = vpop.f32.mrf.mxu1 }
 0x1c6   :  { %v515_v55 = vadd.f32 %v514_v53, %v403_v49 }
 0x1c8   :  { %v541_v59 = vmax.f32 %v515_v55, 0.0 }
 0x1ca   :  { %v552_v61 = vpack.c.bf16 %v541_v59, %v540_v57 }
 0x1cc   :  { %566 = vmatpush.bf16.msrb.mxu2 %v552_v61 }
 0x1d0   :  { %567 = vmatpush.bf16.msrb.mxu2 %v551_v3 }
 0x1d4   :  { %568 = vmatpush.bf16.msrb.mxu2 %v550_v11 }
 0x1d8   :  { %569 = vmatpush.bf16.msrb.mxu2 %v549_v7 }
 0x1dc   :  { %570 = vmatpush.bf16.msrb.mxu2 %v548_v20 }
 0x1df   :  { %571 = vmatmul.bf16.vlgmr.msrb.gmra.mxu2 %v556_v9 }
 0x262   :  { %v572_v13 = vpop.f32.mrf.mxu2 }
 0x263   :  { %v573_v14 = vadd.f32 %v572_v13, %v561_v12 }
 0x265   :  { %576 = vst [vmem:[%s953_s7] sm:$0xff] %v573_v14 }
 0x26a   :  { %v574_v10 = vpop.f32.mrf.mxu2 }

</bundles_post_ra>
